<compile_context>
chip_gen: v7x
topology: tpu7x:2x2x1
jax: 0.10.0
libtpu: 0.0.40
codegen_flags: <defaults>
</compile_context>

<pallas_src>
import functools
import math

import jax
import jax.numpy as jnp
from jax.experimental import pallas as pl
from jax.experimental.pallas import tpu as pltpu

LN_EPS = 1e-5


def _cross_attn_kernel(qres_ref, qh_ref, khT_ref, vh_ref,
                       woT_ref, bo_ref, gamma_ref, beta_ref,
                       o_ref, *, num_heads, approx_recip):
    """One (batch b, row-tile i) grid step.

    qres_ref : (TR, E)      f32   original query rows (residual path)
    qh_ref   : (H, TR, Dh)  cd    pre-projected, pre-scaled, bias-added Q
    khT_ref  : (H, Dh, S)   cd    pre-projected K, already transposed
    vh_ref   : (H, S, Dh)   cd    pre-projected V
    woT_ref  : (H, Dh, E)   cd    out-projection W_o^T split by head
    """
    f32 = jnp.float32
    q_res = qres_ref[...].astype(f32)                       # (TR, E)
    TR, E = q_res.shape

    attn = jnp.zeros((TR, E), f32)
    # Static unroll over heads; all per-head tensors are indexed on a leading dim
    # (free slice).  Only the (TR, E) accumulator stays live across iterations.
    for h in range(num_heads):
        s = jnp.dot(qh_ref[h], khT_ref[h],
                    preferred_element_type=f32)              # (TR, S), scale pre-folded
        m = jnp.max(s, axis=-1, keepdims=True)               # f32 softmax stats (v5e-safe)
        p = jnp.exp(s - m)
        l = jnp.sum(p, axis=-1, keepdims=True)
        ctx = jnp.dot(p.astype(vh_ref.dtype), vh_ref[h],
                      preferred_element_type=f32)            # (TR, Dh)
        # Deferred normalization on the small (TR, Dh) context, not the (TR, S) slab.
        ctx = ctx * pl.reciprocal(l, approx=approx_recip)
        attn = attn + jnp.dot(ctx.astype(woT_ref.dtype), woT_ref[h],
                              preferred_element_type=f32)    # (TR, E)

    # out-proj bias + residual with the original query rows, then LayerNorm
    # (biased variance, eps=1e-5, matching PyTorch) — all fused in VMEM.
    x = attn + bo_ref[...] + q_res
    mean = jnp.mean(x, axis=-1, keepdims=True)
    var = jnp.mean((x - mean) ** 2, axis=-1, keepdims=True)
    y = (x - mean) * jax.lax.rsqrt(var + LN_EPS)
    o_ref[...] = (y * gamma_ref[...] + beta_ref[...]).astype(o_ref.dtype)


def _pick_row_tile(n_rows, target=256):
    """Largest divisor of n_rows that is a multiple of 8 and <= target; else full."""
    if n_rows <= target or n_rows % 8 != 0:
        return n_rows
    best, t = 8, 8
    while t <= target:
        if n_rows % t == 0:
            best = t
        t += 8
    return best


def cross_attention_pallas(query, key, value, params, *, num_heads,
                           compute_dtype=jnp.bfloat16, row_tile=None):
    """query/key/value: (L, N, E) float32, PyTorch nn.MultiheadAttention convention."""
    L, N, E = query.shape
    S = key.shape[0]
    H = num_heads
    assert E % H == 0, "embed_dim must be divisible by num_heads"
    Dh = E // H
    cd = jnp.dtype(compute_dtype)
    strict_f32 = cd == jnp.dtype(jnp.float32)

    # One cheap HBM transpose each: (L, N, E) -> (N, L/S, E).  This replaces the old
    # batch-interleaved row space and its (TR, S*N) additive mask entirely.
    q_b = jnp.transpose(query, (1, 0, 2))                    # (N, L, E)
    k_b = jnp.transpose(key, (1, 0, 2))                      # (N, S, E)
    v_b = jnp.transpose(value, (1, 0, 2))                    # (N, S, E)

    wq, wk, wv = jnp.split(params["in_proj_weight"], 3, axis=0)   # each (E, E), torch (out,in)
    bq, bk, bv = jnp.split(params["in_proj_bias"], 3, axis=0)
    scale = 1.0 / math.sqrt(Dh)

    # Hoisted full-width projections (one XLA matmul each; full-E contraction instead of
    # Dh-wide per-head matmuls recomputed every grid step).  1/sqrt(Dh) folded into Q.
    qh = (jnp.einsum("nle,fe->nlf", q_b, wq) + bq) * scale   # (N, L, E)  f32
    kh = jnp.einsum("nse,fe->nsf", k_b, wk) + bk             # (N, S, E)
    vh = jnp.einsum("nse,fe->nsf", v_b, wv) + bv             # (N, S, E)

    # Per-head layout with head on a leading dim; K pre-transposed for the score matmul.
    # MXU operands are cast to compute_dtype here (bf16 default) so HBM/VMEM traffic is
    # also halved; accumulation and softmax stats stay f32 in the kernel.
    qh = qh.reshape(N, L, H, Dh).transpose(0, 2, 1, 3).astype(cd)   # (N, H, L, Dh)
    khT = kh.reshape(N, S, H, Dh).transpose(0, 2, 3, 1).astype(cd)  # (N, H, Dh, S)
    vh = vh.reshape(N, S, H, Dh).transpose(0, 2, 1, 3).astype(cd)   # (N, H, S, Dh)

    woT = params["out_proj_weight"].T.reshape(H, Dh, E).astype(cd)  # (H, Dh, E)
    bo = params["out_proj_bias"].reshape(1, E).astype(jnp.float32)
    gamma = params["ln_weight"].reshape(1, E).astype(jnp.float32)
    beta = params["ln_bias"].reshape(1, E).astype(jnp.float32)

    TR = row_tile if row_tile is not None else _pick_row_tile(L)
    if L % TR != 0:
        TR = L
    grid = (N, L // TR)   # batch outer (K/V block re-fetched only when b changes), rows inner

    # Explicit VMEM budget derived from actual tile sizes, capped at a v7x-safe value
    # (64 MiB physical there vs 128 MiB on v5e/v6e).  Double-buffer factor 2 on blocks.
    cdb = cd.itemsize
    per_step = (TR * E * 4                # q residual block
                + H * TR * Dh * cdb       # qh block
                + H * Dh * S * cdb        # K^T block
                + H * S * Dh * cdb        # V block
                + H * Dh * E * cdb        # out-proj weight
                + 3 * E * 4               # bo / gamma / beta
                + TR * E * 4)             # output block
    temps = 2 * TR * S * 4 + 6 * TR * E * 4
    vmem_limit = int(min(max(2 * per_step + temps + (2 << 20), 32 << 20), 56 << 20))

    kernel = functools.partial(_cross_attn_kernel, num_heads=H,
                               approx_recip=not strict_f32)

    sq = pl.Squeezed()
    out = pl.pallas_call(
        kernel,
        out_shape=jax.ShapeDtypeStruct((N, L, E), query.dtype),
        grid_spec=pltpu.PrefetchScalarGridSpec(
            num_scalar_prefetch=0,
            grid=grid,
            in_specs=[
                pl.BlockSpec((sq, TR, E), lambda b, i: (b, i, 0)),         # q residual rows
                pl.BlockSpec((sq, H, TR, Dh), lambda b, i: (b, 0, i, 0)),  # Q projected
                pl.BlockSpec((sq, H, Dh, S), lambda b, i: (b, 0, 0, 0)),   # K^T (per batch)
                pl.BlockSpec((sq, H, S, Dh), lambda b, i: (b, 0, 0, 0)),   # V   (per batch)
                pl.BlockSpec((H, Dh, E), lambda b, i: (0, 0, 0)),          # Wo^T per head
                pl.BlockSpec((1, E), lambda b, i: (0, 0)),                 # bo
                pl.BlockSpec((1, E), lambda b, i: (0, 0)),                 # LN gamma
                pl.BlockSpec((1, E), lambda b, i: (0, 0)),                 # LN beta
            ],
            out_specs=pl.BlockSpec((sq, TR, E), lambda b, i: (b, i, 0)),
        ),
        compiler_params=pltpu.CompilerParams(
            dimension_semantics=("parallel", "parallel"),
            vmem_limit_bytes=vmem_limit),
    )(q_b, qh, khT, vh, woT, bo, gamma, beta)

    return jnp.transpose(out, (1, 0, 2))                     # back to (L, N, E)


def cross_attention_reference(query, key, value, params, *, num_heads):
    """Pure-JAX reference matching torch.nn.MultiheadAttention + residual + LayerNorm."""
    L, N, E = query.shape
    S = key.shape[0]
    Dh = E // num_heads
    wq, wk, wv = jnp.split(params["in_proj_weight"], 3, axis=0)
    bq, bk, bv = jnp.split(params["in_proj_bias"], 3, axis=0)

    def proj(x, w, b):      # x: (T, N, E)
        return jnp.einsum("tne,fe->tnf", x, w) + b

    qp, kp, vp = proj(query, wq, bq), proj(key, wk, bk), proj(value, wv, bv)

    def heads(x, T):        # (T, N, E) -> (N, H, T, Dh)
        return x.reshape(T, N, num_heads, Dh).transpose(1, 2, 0, 3)

    qh, kh, vh = heads(qp, L), heads(kp, S), heads(vp, S)
    scores = jnp.einsum("nhld,nhsd->nhls", qh, kh) / (Dh ** 0.5)
    probs = jax.nn.softmax(scores, axis=-1)
    ctx = jnp.einsum("nhls,nhsd->nhld", probs, vh)
    ctx = ctx.transpose(2, 0, 1, 3).reshape(L, N, E)
    attn = jnp.einsum("lne,fe->lnf", ctx, params["out_proj_weight"]) + params["out_proj_bias"]

    x = attn + query
    mean = jnp.mean(x, axis=-1, keepdims=True)
    var = jnp.mean((x - mean) ** 2, axis=-1, keepdims=True)
    y = (x - mean) / jnp.sqrt(var + LN_EPS)
    return y * params["ln_weight"] + params["ln_bias"]


def init_params(key, latent_dim):
    k1, k2, k3, k4 = jax.random.split(key, 4)
    scale = 1.0 / (latent_dim ** 0.5)
    return {
        "in_proj_weight": jax.random.uniform(k1, (3 * latent_dim, latent_dim),
                                             jnp.float32, -scale, scale),
        "in_proj_bias": jax.random.uniform(k2, (3 * latent_dim,),
                                           jnp.float32, -scale, scale),
        "out_proj_weight": jax.random.uniform(k3, (latent_dim, latent_dim),
                                              jnp.float32, -scale, scale),
        "out_proj_bias": jax.random.uniform(k4, (latent_dim,),
                                            jnp.float32, -scale, scale),
        "ln_weight": jnp.ones((latent_dim,), jnp.float32),
        "ln_bias": jnp.zeros((latent_dim,), jnp.float32),
    }


if __name__ == "__main__":
    L, N, E, H = 8, 2, 32, 2          # seq=8, batch=2, latent_dim=32, heads=2
    root = jax.random.PRNGKey(0)
    kq, kk, kv, kp = jax.random.split(root, 4)

    query = jax.random.normal(kq, (L, N, E), jnp.float32)
    key = jax.random.normal(kk, (L, N, E), jnp.float32)
    value = jax.random.normal(kv, (L, N, E), jnp.float32)
    params = init_params(kp, E)

    ref = cross_attention_reference(query, key, value, params, num_heads=H)

    # Strict f32 parity mode (1e-4 vs the PyTorch-style reference).
    out_f32 = jax.block_until_ready(
        cross_attention_pallas(query, key, value, params, num_heads=H,
                               compute_dtype=jnp.float32))
    assert out_f32.shape == (L, N, E)
    assert jnp.allclose(out_f32, ref, atol=1e-4, rtol=1e-4), "f32 mismatch vs reference"

    # Default bf16-operand / f32-accumulate mode (looser numerical parity).
    out_bf16 = jax.block_until_ready(
        cross_attention_pallas(query, key, value, params, num_heads=H))
    assert out_bf16.shape == (L, N, E)
    assert jnp.allclose(out_bf16, ref, atol=3e-2, rtol=3e-2), "bf16 mismatch vs reference"

    print("KERNEL_OK")
</pallas_src>

<mosaic_0001>
module attributes {stable_mosaic.version = 11 : i64} {
  func.func @_cross_attn_kernel(%arg0: i32, %arg1: i32, %arg2: memref<1x8x32xf32, #tpu.memory_space<vmem>>, %arg3: memref<1x2x8x16xf32, #tpu.memory_space<vmem>>, %arg4: memref<1x2x16x8xf32, #tpu.memory_space<vmem>>, %arg5: memref<1x2x8x16xf32, #tpu.memory_space<vmem>>, %arg6: memref<2x16x32xf32, #tpu.memory_space<vmem>>, %arg7: memref<1x32xf32, #tpu.memory_space<vmem>>, %arg8: memref<1x32xf32, #tpu.memory_space<vmem>>, %arg9: memref<1x32xf32, #tpu.memory_space<vmem>>, %arg10: memref<1x8x32xf32, #tpu.memory_space<vmem>>) attributes {dimension_semantics = [#tpu.dimension_semantics<parallel>, #tpu.dimension_semantics<parallel>], iteration_bounds = array<i64: 2, 1>, scalar_prefetch = 0 : i64, scratch_operands = 0 : i64, tpu.core_type = #tpu.core_type<tc>, window_params = [{transform_indices = @transform_0, window_bounds = array<i64: 1, 8, 32>}, {transform_indices = @transform_1, window_bounds = array<i64: 1, 2, 8, 16>}, {transform_indices = @transform_2, window_bounds = array<i64: 1, 2, 16, 8>}, {transform_indices = @transform_3, window_bounds = array<i64: 1, 2, 8, 16>}, {pipeline_mode = #tpu.pipeline_mode<synchronous>, transform_indices = @transform_4, window_bounds = array<i64: 2, 16, 32>}, {pipeline_mode = #tpu.pipeline_mode<synchronous>, transform_indices = @transform_5, window_bounds = array<i64: 1, 32>}, {pipeline_mode = #tpu.pipeline_mode<synchronous>, transform_indices = @transform_6, window_bounds = array<i64: 1, 32>}, {pipeline_mode = #tpu.pipeline_mode<synchronous>, transform_indices = @transform_7, window_bounds = array<i64: 1, 32>}, {transform_indices = @transform_8, window_bounds = array<i64: 1, 8, 32>}]} {
    %c0 = arith.constant 0 : index
    %c0_0 = arith.constant 0 : index
    %c0_1 = arith.constant 0 : index
    %0 = vector.load %arg2[%c0, %c0_0, %c0_1] : memref<1x8x32xf32, #tpu.memory_space<vmem>>, vector<1x8x32xf32>
    %1 = vector.shape_cast %0 : vector<1x8x32xf32> to vector<8x32xf32>
    %cst = arith.constant 0.000000e+00 : f32
    %2 = vector.broadcast %cst : f32 to vector<8x32xf32>
    %c0_2 = arith.constant 0 : index
    %c0_3 = arith.constant 0 : index
    %c0_4 = arith.constant 0 : index
    %c0_5 = arith.constant 0 : index
    %3 = vector.load %arg3[%c0_2, %c0_3, %c0_4, %c0_5] : memref<1x2x8x16xf32, #tpu.memory_space<vmem>>, vector<1x1x8x16xf32>
    %4 = vector.shape_cast %3 : vector<1x1x8x16xf32> to vector<8x16xf32>
    %c0_6 = arith.constant 0 : index
    %c0_7 = arith.constant 0 : index
    %c0_8 = arith.constant 0 : index
    %c0_9 = arith.constant 0 : index
    %5 = vector.load %arg4[%c0_6, %c0_7, %c0_8, %c0_9] : memref<1x2x16x8xf32, #tpu.memory_space<vmem>>, vector<1x1x16x8xf32>
    %6 = vector.shape_cast %5 : vector<1x1x16x8xf32> to vector<16x8xf32>
    %cst_10 = arith.constant dense<0.000000e+00> : vector<8x8xf32>
    %7 = tpu.matmul %4, %6, %cst_10 {dimension_numbers = #tpu.dot_dimension_numbers<[1], [0], [0], [1], [0, 0, 1, 1], [], []>} : vector<8x16xf32>, vector<16x8xf32>, vector<8x8xf32> -> vector<8x8xf32>
    %cst_11 = arith.constant dense<0xFF800000> : vector<8xf32>
    %8 = vector.multi_reduction <maximumf>, %7, %cst_11 [1] : vector<8x8xf32> to vector<8xf32>
    %9 = vector.shape_cast %8 : vector<8xf32> to vector<8x1xf32>
    %10 = vector.broadcast %9 : vector<8x1xf32> to vector<8x8xf32>
    %11 = arith.subf %7, %10 : vector<8x8xf32>
    %12 = math.exp %11 : vector<8x8xf32>
    %cst_12 = arith.constant dense<0.000000e+00> : vector<8xf32>
    %13 = vector.multi_reduction <add>, %12, %cst_12 [1] : vector<8x8xf32> to vector<8xf32>
    %14 = vector.shape_cast %13 : vector<8xf32> to vector<8x1xf32>
    %c0_13 = arith.constant 0 : index
    %c0_14 = arith.constant 0 : index
    %c0_15 = arith.constant 0 : index
    %c0_16 = arith.constant 0 : index
    %15 = vector.load %arg5[%c0_13, %c0_14, %c0_15, %c0_16] : memref<1x2x8x16xf32, #tpu.memory_space<vmem>>, vector<1x1x8x16xf32>
    %16 = vector.shape_cast %15 : vector<1x1x8x16xf32> to vector<8x16xf32>
    %cst_17 = arith.constant dense<0.000000e+00> : vector<8x16xf32>
    %17 = tpu.matmul %12, %16, %cst_17 {dimension_numbers = #tpu.dot_dimension_numbers<[1], [0], [0], [1], [0, 0, 1, 1], [], []>} : vector<8x8xf32>, vector<8x16xf32>, vector<8x16xf32> -> vector<8x16xf32>
    %18 = tpu.reciprocal %14 : vector<8x1xf32> -> vector<8x1xf32>
    %19 = vector.broadcast %18 : vector<8x1xf32> to vector<8x16xf32>
    %20 = arith.mulf %17, %19 : vector<8x16xf32>
    %c0_18 = arith.constant 0 : index
    %c0_19 = arith.constant 0 : index
    %c0_20 = arith.constant 0 : index
    %21 = vector.load %arg6[%c0_18, %c0_19, %c0_20] : memref<2x16x32xf32, #tpu.memory_space<vmem>>, vector<1x16x32xf32>
    %22 = vector.shape_cast %21 : vector<1x16x32xf32> to vector<16x32xf32>
    %cst_21 = arith.constant dense<0.000000e+00> : vector<8x32xf32>
    %23 = tpu.matmul %20, %22, %cst_21 {dimension_numbers = #tpu.dot_dimension_numbers<[1], [0], [0], [1], [0, 0, 1, 1], [], []>} : vector<8x16xf32>, vector<16x32xf32>, vector<8x32xf32> -> vector<8x32xf32>
    %24 = arith.addf %2, %23 : vector<8x32xf32>
    %c0_22 = arith.constant 0 : index
    %c1 = arith.constant 1 : index
    %c0_23 = arith.constant 0 : index
    %c0_24 = arith.constant 0 : index
    %25 = vector.load %arg3[%c0_22, %c1, %c0_23, %c0_24] : memref<1x2x8x16xf32, #tpu.memory_space<vmem>>, vector<1x1x8x16xf32>
    %26 = vector.shape_cast %25 : vector<1x1x8x16xf32> to vector<8x16xf32>
    %c0_25 = arith.constant 0 : index
    %c1_26 = arith.constant 1 : index
    %c0_27 = arith.constant 0 : index
    %c0_28 = arith.constant 0 : index
    %27 = vector.load %arg4[%c0_25, %c1_26, %c0_27, %c0_28] : memref<1x2x16x8xf32, #tpu.memory_space<vmem>>, vector<1x1x16x8xf32>
    %28 = vector.shape_cast %27 : vector<1x1x16x8xf32> to vector<16x8xf32>
    %cst_29 = arith.constant dense<0.000000e+00> : vector<8x8xf32>
    %29 = tpu.matmul %26, %28, %cst_29 {dimension_numbers = #tpu.dot_dimension_numbers<[1], [0], [0], [1], [0, 0, 1, 1], [], []>} : vector<8x16xf32>, vector<16x8xf32>, vector<8x8xf32> -> vector<8x8xf32>
    %cst_30 = arith.constant dense<0xFF800000> : vector<8xf32>
    %30 = vector.multi_reduction <maximumf>, %29, %cst_30 [1] : vector<8x8xf32> to vector<8xf32>
    %31 = vector.shape_cast %30 : vector<8xf32> to vector<8x1xf32>
    %32 = vector.broadcast %31 : vector<8x1xf32> to vector<8x8xf32>
    %33 = arith.subf %29, %32 : vector<8x8xf32>
    %34 = math.exp %33 : vector<8x8xf32>
    %cst_31 = arith.constant dense<0.000000e+00> : vector<8xf32>
    %35 = vector.multi_reduction <add>, %34, %cst_31 [1] : vector<8x8xf32> to vector<8xf32>
    %36 = vector.shape_cast %35 : vector<8xf32> to vector<8x1xf32>
    %c0_32 = arith.constant 0 : index
    %c1_33 = arith.constant 1 : index
    %c0_34 = arith.constant 0 : index
    %c0_35 = arith.constant 0 : index
    %37 = vector.load %arg5[%c0_32, %c1_33, %c0_34, %c0_35] : memref<1x2x8x16xf32, #tpu.memory_space<vmem>>, vector<1x1x8x16xf32>
    %38 = vector.shape_cast %37 : vector<1x1x8x16xf32> to vector<8x16xf32>
    %cst_36 = arith.constant dense<0.000000e+00> : vector<8x16xf32>
    %39 = tpu.matmul %34, %38, %cst_36 {dimension_numbers = #tpu.dot_dimension_numbers<[1], [0], [0], [1], [0, 0, 1, 1], [], []>} : vector<8x8xf32>, vector<8x16xf32>, vector<8x16xf32> -> vector<8x16xf32>
    %40 = tpu.reciprocal %36 : vector<8x1xf32> -> vector<8x1xf32>
    %41 = vector.broadcast %40 : vector<8x1xf32> to vector<8x16xf32>
    %42 = arith.mulf %39, %41 : vector<8x16xf32>
    %c1_37 = arith.constant 1 : index
    %c0_38 = arith.constant 0 : index
    %c0_39 = arith.constant 0 : index
    %43 = vector.load %arg6[%c1_37, %c0_38, %c0_39] : memref<2x16x32xf32, #tpu.memory_space<vmem>>, vector<1x16x32xf32>
    %44 = vector.shape_cast %43 : vector<1x16x32xf32> to vector<16x32xf32>
    %cst_40 = arith.constant dense<0.000000e+00> : vector<8x32xf32>
    %45 = tpu.matmul %42, %44, %cst_40 {dimension_numbers = #tpu.dot_dimension_numbers<[1], [0], [0], [1], [0, 0, 1, 1], [], []>} : vector<8x16xf32>, vector<16x32xf32>, vector<8x32xf32> -> vector<8x32xf32>
    %46 = arith.addf %24, %45 : vector<8x32xf32>
    %c0_41 = arith.constant 0 : index
    %c0_42 = arith.constant 0 : index
    %47 = vector.load %arg7[%c0_41, %c0_42] : memref<1x32xf32, #tpu.memory_space<vmem>>, vector<1x32xf32>
    %48 = vector.broadcast %47 : vector<1x32xf32> to vector<8x32xf32>
    %49 = arith.addf %46, %48 : vector<8x32xf32>
    %50 = arith.addf %49, %1 : vector<8x32xf32>
    %cst_43 = arith.constant dense<0.000000e+00> : vector<8xf32>
    %51 = vector.multi_reduction <add>, %50, %cst_43 [1] : vector<8x32xf32> to vector<8xf32>
    %52 = vector.shape_cast %51 : vector<8xf32> to vector<8x1xf32>
    %cst_44 = arith.constant 3.200000e+01 : f32
    %53 = vector.broadcast %cst_44 : f32 to vector<8x1xf32>
    %54 = arith.divf %52, %53 : vector<8x1xf32>
    %55 = vector.broadcast %54 : vector<8x1xf32> to vector<8x32xf32>
    %56 = arith.subf %50, %55 : vector<8x32xf32>
    %57 = arith.mulf %56, %56 : vector<8x32xf32>
    %cst_45 = arith.constant dense<0.000000e+00> : vector<8xf32>
    %58 = vector.multi_reduction <add>, %57, %cst_45 [1] : vector<8x32xf32> to vector<8xf32>
    %59 = vector.shape_cast %58 : vector<8xf32> to vector<8x1xf32>
    %cst_46 = arith.constant 3.200000e+01 : f32
    %60 = vector.broadcast %cst_46 : f32 to vector<8x1xf32>
    %61 = arith.divf %59, %60 : vector<8x1xf32>
    %62 = vector.broadcast %54 : vector<8x1xf32> to vector<8x32xf32>
    %63 = arith.subf %50, %62 : vector<8x32xf32>
    %cst_47 = arith.constant 9.99999974E-6 : f32
    %64 = vector.broadcast %cst_47 : f32 to vector<8x1xf32>
    %65 = arith.addf %61, %64 : vector<8x1xf32>
    %66 = math.rsqrt %65 : vector<8x1xf32>
    %67 = vector.broadcast %66 : vector<8x1xf32> to vector<8x32xf32>
    %68 = arith.mulf %63, %67 : vector<8x32xf32>
    %c0_48 = arith.constant 0 : index
    %c0_49 = arith.constant 0 : index
    %69 = vector.load %arg8[%c0_48, %c0_49] : memref<1x32xf32, #tpu.memory_space<vmem>>, vector<1x32xf32>
    %70 = vector.broadcast %69 : vector<1x32xf32> to vector<8x32xf32>
    %71 = arith.mulf %68, %70 : vector<8x32xf32>
    %c0_50 = arith.constant 0 : index
    %c0_51 = arith.constant 0 : index
    %72 = vector.load %arg9[%c0_50, %c0_51] : memref<1x32xf32, #tpu.memory_space<vmem>>, vector<1x32xf32>
    %73 = vector.broadcast %72 : vector<1x32xf32> to vector<8x32xf32>
    %74 = arith.addf %71, %73 : vector<8x32xf32>
    %c0_52 = arith.constant 0 : index
    %c0_53 = arith.constant 0 : index
    %c0_54 = arith.constant 0 : index
    %75 = vector.load %arg10[%c0_52, %c0_53, %c0_54] : memref<1x8x32xf32, #tpu.memory_space<vmem>>, vector<1x8x32xf32>
    %76 = vector.shape_cast %75 : vector<1x8x32xf32> to vector<8x32xf32>
    %77 = vector.shape_cast %74 : vector<8x32xf32> to vector<1x8x32xf32>
    tpu.vector_store %arg10[%c0_52, %c0_53, %c0_54], %77 {strides = array<i32>} : memref<1x8x32xf32, #tpu.memory_space<vmem>>, vector<1x8x32xf32>,
    return
  }
  func.func @transform_0(%arg0: i32, %arg1: i32) -> (i32, i32, i32) {
    %c0_i32 = arith.constant 0 : i32
    %c0_i32_0 = arith.constant 0 : i32
    return %arg0, %arg1, %c0_i32 : i32, i32, i32
  }
  func.func @transform_1(%arg0: i32, %arg1: i32) -> (i32, i32, i32, i32) {
    %c0_i32 = arith.constant 0 : i32
    %c0_i32_0 = arith.constant 0 : i32
    %c0_i32_1 = arith.constant 0 : i32
    return %arg0, %c0_i32, %arg1, %c0_i32_0 : i32, i32, i32, i32
  }
  func.func @transform_2(%arg0: i32, %arg1: i32) -> (i32, i32, i32, i32) {
    %c0_i32 = arith.constant 0 : i32
    %c0_i32_0 = arith.constant 0 : i32
    %c0_i32_1 = arith.constant 0 : i32
    %c0_i32_2 = arith.constant 0 : i32
    return %arg0, %c0_i32, %c0_i32_0, %c0_i32_1 : i32, i32, i32, i32
  }
  func.func @transform_3(%arg0: i32, %arg1: i32) -> (i32, i32, i32, i32) {
    %c0_i32 = arith.constant 0 : i32
    %c0_i32_0 = arith.constant 0 : i32
    %c0_i32_1 = arith.constant 0 : i32
    %c0_i32_2 = arith.constant 0 : i32
    return %arg0, %c0_i32, %c0_i32_0, %c0_i32_1 : i32, i32, i32, i32
  }
  func.func @transform_4(%arg0: i32, %arg1: i32) -> (i32, i32, i32) {
    %c0_i32 = arith.constant 0 : i32
    %c0_i32_0 = arith.constant 0 : i32
    %c0_i32_1 = arith.constant 0 : i32
    %c0_i32_2 = arith.constant 0 : i32
    return %c0_i32, %c0_i32_0, %c0_i32_1 : i32, i32, i32
  }
  func.func @transform_5(%arg0: i32, %arg1: i32) -> (i32, i32) {
    %c0_i32 = arith.constant 0 : i32
    %c0_i32_0 = arith.constant 0 : i32
    %c0_i32_1 = arith.constant 0 : i32
    return %c0_i32, %c0_i32_0 : i32, i32
  }
  func.func @transform_6(%arg0: i32, %arg1: i32) -> (i32, i32) {
    %c0_i32 = arith.constant 0 : i32
    %c0_i32_0 = arith.constant 0 : i32
    %c0_i32_1 = arith.constant 0 : i32
    return %c0_i32, %c0_i32_0 : i32, i32
  }
  func.func @transform_7(%arg0: i32, %arg1: i32) -> (i32, i32) {
    %c0_i32 = arith.constant 0 : i32
    %c0_i32_0 = arith.constant 0 : i32
    %c0_i32_1 = arith.constant 0 : i32
    return %c0_i32, %c0_i32_0 : i32, i32
  }
  func.func @transform_8(%arg0: i32, %arg1: i32) -> (i32, i32, i32) {
    %c0_i32 = arith.constant 0 : i32
    %c0_i32_0 = arith.constant 0 : i32
    return %arg0, %arg1, %c0_i32 : i32, i32, i32
  }
}

</mosaic_0001>

<bundles_post_ra>
// kernel: tpu_custom_call.1
= control target key start
LH: loop header
LB: loop body
LE: loop exit
PB: predicated region body
PF: predicated region fallthrough
CT: control target
= control target key end

     0   :  { %13 = vsyncpa [#allocation3], 0  ;;  %s1646_s0 = inlined_call_operand.hbm [shape: f32[2,8,32], index: 0, kind: input, shape index: {}]   ;;  %s1647_s1 = inlined_call_operand.vmem [shape: f32[2,2,8,16], index: 1, kind: input, shape index: {}]   ;;  %s1648_s2 = inlined_call_operand.vmem [shape: f32[2,2,16,8], index: 2, kind: input, shape index: {}]   ;;  %s1649_s3 = inlined_call_operand.vmem [shape: f32[2,2,8,16], index: 3, kind: input, shape index: {}]   ;;  %s1650_s4 = inlined_call_operand.vmem [shape: f32[2,16,32], index: 4, kind: input, shape index: {}]   ;;  %s1651_s5 = inlined_call_operand.vmem [shape: f32[1,32], index: 5, kind: input, shape index: {}]   ;;  %s1652_s6 = inlined_call_operand.vmem [shape: f32[1,32], index: 6, kind: input, shape index: {}]   ;;  %s1653_s7 = inlined_call_operand.vmem [shape: f32[1,32], index: 7, kind: input, shape index: {}]   ;;  %s1654_s8 = inlined_call_operand.hbm [shape: f32[2,8,32], index: 8, kind: output, shape index: {}]  }
   0x1   :  { %15 = vsyncpa [#allocation3 + $0x1], 0 }
   0x2   :  { %16 = vsyncpa [#allocation4], 0 }
   0x3   :  { %18 = vsyncpa [#allocation4 + $0x1], 0  ;;  %s1408_s27 = smov 0   ;;  %s1410_s28 = smov 0  }
   0x4   :  { %s1412_s29 = smov 0   ;;  %s1414_s30 = smov 0  }
   0x5   :  { %s1416_s9 = smov 0   ;;  %s1418_s10 = smov 0  }
   0x6 LB: > { %s1066_s11 = sadd.s32 4294967295, %s1356_s10   ;;  %s1067_s12 = sadd.s32 4294967294, %s1356_s10   ;;  %s1356_s10 = sphi %s1418_s10, %s24_s10   ;;  %s1352_s9 = sphi %s1416_s9, %s1670_s9   ;;  %s1348_s30 = sphi %s1414_s30, %s1669_s30   ;;  %s1344_s29 = sphi %s1412_s29, %s1668_s29   ;;  %s1340_s28 = sphi %s1410_s28, %s1667_s28   ;;  %s1336_s27 = sphi %s1408_s27, %s1666_s27  }
   0x7   : > { %s36_s13 = sadd.s32 1, %s1352_s9  ;;  %s45_s14 = sadd.s32 1, %s1344_s29 }
   0x8   : > { %p38_p0 = scmp.ge.s32.totalorder %s36_s13, 2  ;;  %p52_p1 = scmp.ne.s32.totalorder %s1344_s29, %s1340_s28 }
   0x9   : > { %p53_p2 = scmp.eq.s32.totalorder %s1356_s10, 0  ;;  %p58_p3 = scmp.ne.s32.totalorder %s1340_s28, %s1336_s27 }
   0xa   : > { %s1672_s13 = smov (%p38_p0, %s36_s13), 0  ;;  %p59_p5 = scmp.eq.s32.totalorder %s1066_s11, 0 }
   0xb   : > { %p1449_p4 = por %p53_p2, %p52_p1  ;;  %s40_s16 = ssub.s32 %s1352_s9, %s1672_s13 }
   0xc   : > { %p248_p6 = scmp.eq.s32.totalorder %s1066_s11, 1  ;;  %p43_p7 = scmp.eq.s32.totalorder %s40_s16, 0 }
   0xd   : > { %p1455_p8 = por %p59_p5, %p58_p3  ;;  %p254_p10 = scmp.eq.s32.totalorder %s1067_s12, 1 }
   0xe   : > { %p1459_p9 = por %p248_p6, %p52_p1  ;;  %p1181_p13 = scmp.lt.s32.totalorder %s1356_s10, 2 }
   0xf   : > { %s1464_s19 = scalar_select %p43_p7, %s1344_s29, %s45_s14  }
  0x10   : > { %s1658_s18 = scalar_select %p1459_p9, 1, 0 }
  0x11   : > { %p1466_p11 = por %p254_p10, %p58_p3  ;;  %s286_s21 = sand.u32 1, %s1344_s29  }
  0x12   : > { %s1070_s22 = sshll.u32 %s286_s21, 3  ;;  %s1071_s23 = sshll.u32 %s1352_s9, 7 }
  0x13   : > { %s1659_s20 = scalar_select %p1466_p11, 1, 0 }
  0x14   : > { %s1477_s26 = scalar_lea.hbm %s1646_s0, %s1071_s23  ;;  %s290_s11 = scalar_lea.vmem [#allocation2], %s1070_s22 }
  0x15   : > { %s298_s12 = sshll.u32 %s290_s11, 4  ;;  %p1483_p0 = pnand %p1181_p13, %p1449_p4  ;;  %s1479_s12 = int_to_ptr.vmem [resolvable:$true] %s298_s12 }
  0x16   : > { %s287_s16 = scalar_lea.sflag [#allocation3], %s286_s21  ;;  %s1244_s23 = scalar_lea.hbm %s1477_s26, 128 }
  0x17   : > { %p1245_p3 = scmp.ne.s32.totalorder %s1477_s26, %s1244_s23  ;;  %p1246_p5 = pneg %p1483_p0 }
  0x18   : > { %s1249_s15 = scalar_lea.hbm %s1646_s0, 256  ;;  %p1250_p4 = scmp.lt.u32.totalorder %s1477_s26, %s1646_s0 }
  0x19   : > { %p1247_p6 = pnand %p1246_p5, %p1245_p3  ;;  %p1251_p10 = scmp.lt.u32.totalorder %s1249_s15, %s1244_s23 }
  0x1a   : > { %p1253_p12 = scmp.lt.u32.totalorder %s1244_s23, %s1477_s26 }
  0x1b   : > { %p1248_p7 = pneg %p1247_p6  ;;  %p1252_p13 = por %p1251_p10, %p1250_p4 }
  0x1d   : > { %p1254_p1 = por %p1253_p12, %p1252_p13 }
  0x1f   : > { %p1255_p2 = pnand %p1254_p1, %p1248_p7 }
  0x21   : > { %1258 = shalt.err (!%p1255_p2)
}
  0x22   : > { %s1259_s21 = scalar_lea.vmem %s1479_s12, 128  ;;  %s1358_s22 = smov [#allocation2]  }
  0x23   : > { %p1260_p3 = scmp.ne.s32.totalorder %s1479_s12, %s1259_s21  ;;  %s1264_s24 = sshll.u32 %s1358_s22, 4  ;;  %s1265_s24 = int_to_ptr.vmem [resolvable:$false] %s1264_s24 }
  0x24   : > { %s1266_s25 = scalar_lea.vmem %s1265_s24, 256  ;;  %p1267_p9 = scmp.lt.s32.totalorder %s1479_s12, %s1265_s24 }
  0x25   : > { %p1262_p6 = pnand %p1260_p3, %p1246_p5  ;;  %p1268_p4 = scmp.lt.s32.totalorder %s1266_s25, %s1259_s21 }
  0x27   : > { %p1263_p11 = pneg %p1262_p6  ;;  %p1269_p10 = por %p1268_p4, %p1267_p9 }
  0x29   : > { %p1270_p12 = pnand %p1269_p10, %p1263_p11 }
  0x2b   : > { %1273 = shalt.err (!%p1270_p12)
}
  0x2c   : > { %1176 = dma.hbm_to_vmem [thread:$0]  (!%p1483_p0), %s1477_s26, 128, %s1479_s12, %s287_s16  }
  0x2d   : > { %p1661_p1 = scmp.lt.s32.totalorder %s1356_s10, 3  ;;  %p1662_p2 = scmp.ge.s32.totalorder %s1356_s10, 1 }
  0x2f   : > { %p331_p5 = pnand %p1662_p2, %p1661_p1 }
  0x30   : > { %s1519_s23 = sand.u32 (!%p331_p5), 1, %s1340_s28  }
  0x31   : > { %334 = sbr.rel (%p331_p5) target bundleno = 1572 (0x624), region = 52  ;;  %s1073_s15 = sshll.u32 (!%p331_p5), %s1519_s23, 3 }
  0x32   : > { %s337_s11 = scalar_lea.sflag (!%p331_p5), [#allocation3], %s1519_s23  ;;  %s1525_s14 = scalar_lea.vmem (!%p331_p5), [#allocation2], %s1073_s15 }
  0x38   : > { %1327 = dma.done.wait (%p1455_p8), %s337_s11, 128  }
  0x39   : > { %1329 = vsyncadd (%p1455_p8), %s337_s11, 4294967168  ;;  %p391_p9 = scmp.lt.s32.totalorder %s1348_s30, 1  ;;  %v1359_v0 = vmov 0.0|0.0   ;;  %vm1360_vm0 = vmmov 0   ;;  %v1361_v1 = vmov 0.0   ;;  %vm413_vm1 = vcmask 130048  }
  0x3a   : > { %1157 = vmatprep.subr.bf16.mxu0 %v1359_v0  ;;  %1123 = vmatprep.mubr.msk.f32.mxu0 %vm1360_vm0, %v1361_v1  ;;  %vm487_vm2 = vcmask 64512   ;;  %v573_v29 = vld [vmem:[%s1650_s4] sm:$0xff]  ;;  %v574_v30 = vld [vmem:[%s1650_s4 + $0x8] sm:$0xff]  ;;  %v1089_v36 = vld [vmem:[%s1650_s4 + $0x10] sm:$0xff]  ;;  %vm897_vm3 = vcmask 261120   ;;  %s1097_s25 = sshll.u32 %s1348_s30, 7 }
  0x3b   : > { %s392_s26 = scalar_select %p391_p9, %s1348_s30, 1  ;;  %1126 = vmatprep.subr.mxu1 %v1361_v1  ;;  %1128 = vmatprep.mubr.msk.f32.mxu1 %vm1360_vm0, %v1361_v1  ;;  %v1167_v31 = vpack.c.bf16 %v574_v30, %v573_v29  ;;  %v1090_v37 = vld [vmem:[%s1650_s4 + $0x18] sm:$0xff]  ;;  %v1093_v47 = vld [vmem:[%s1651_s5] ss:$0 sm:$0xff] }
  0x3c   : > { %v1164_v38 = vpack.c.bf16 %v1090_v37, %v1089_v36  ;;  %v409_v50 = vld [vmem:[%s1525_s14] sm:$0xff]  ;;  %s930_s14 = scalar_lea.sflag [#allocation4], %s1519_s23  ;;  %p1663_p11 = scmp.ne.s32.totalorder %s1658_s18, 0 }
  0x3d   : > { %s1101_s12 = sshll.u32 %s392_s26, 5  ;;  %s1100_s16 = sshll.u32 %s392_s26, 4  ;;  %v1094_v63 = vld [vmem:[%s1652_s6] ss:$0 sm:$0xff] }
  0x3e   : > { %s403_s22 = scalar_lea.vmem %s1648_s2, %s1101_s12  ;;  %s398_s11 = scalar_lea.vmem %s1647_s1, %s1100_s16 }
  0x3f   : > { %v411_v2 = vld [vmem:[%s403_s22] sm:$0xff]  ;;  %v412_v3 = vld [vmem:[%s403_s22 + $0x8] sm:$0xff]  ;;  %s408_s17 = scalar_lea.vmem %s1649_s3, %s1100_s16  ;;  %v1084_v14 = vld [vmem:[%s403_s22 + $0x10] sm:$0xff]  ;;  %s1596_s16 = scalar_lea.hbm %s1654_s8, %s1097_s25 }
  0x40   : > { %v1158_v4 = vpack.c.bf16 %v412_v3, %v411_v2  ;;  %v410_v5 = vld [vmem:[%s398_s11] sm:$0xff]  ;;  %v1087_v10 = vld [vmem:[%s408_s17 + $0x8] sm:$0xff]  ;;  %v1085_v15 = vld [vmem:[%s403_s22 + $0x18] sm:$0xff]  ;;  %s1362_s30 = smov [#allocation5]  }
  0x41   : > { %v497_v9 = vld [vmem:[%s408_s17] sm:$0xff]  ;;  %v1161_v16 = vpack.c.bf16 %v1085_v15, %v1084_v14  ;;  %v1083_v19 = vld [vmem:[%s398_s11 + $0x8] sm:$0xff]  ;;  %s390_s11 = scalar_lea.vmem [#allocation5], %s1073_s15  ;;  %s1278_s15 = sshll.u32 %s1362_s30, 4  ;;  %s1279_s15 = int_to_ptr.vmem [resolvable:$false] %s1278_s15 }
  0x42   : > { %1159 = vmatpush3.bf16.msra.mxu0 %v1158_v4  ;;  %1127 = vmatpush3.msra.mxu1 %v497_v9  ;;  %s944_s26 = sshll.u32 %s390_s11, 4  ;;  %s1280_s22 = scalar_lea.vmem %s1279_s15, 256  ;;  %s1598_s26 = int_to_ptr.vmem [resolvable:$true] %s944_s26 }
  0x43   : > { %1138 = vmatprep.subr.mxu0 %v1361_v1  ;;  %1160 = vmatprep.subr.bf16.mxu1 %v1359_v0  ;;  %s1274_s21 = scalar_lea.vmem %s1598_s26, 128  ;;  %p1281_p13 = scmp.lt.s32.totalorder %s1598_s26, %s1279_s15 }
  0x44   : > { %p1275_p8 = scmp.ne.s32.totalorder %s1598_s26, %s1274_s21  ;;  %p1282_p3 = scmp.lt.s32.totalorder %s1280_s22, %s1274_s21 }
  0x45   : > { %1124 = vmatmul.mubr.msk.f32.vlgmr.msra.gmra.mrb[0].mxu0 %vm413_vm1, %v410_v5 }
  0x46   : > { %1140 = vmatprep.mubr.msk.f32.mxu0 %vm1360_vm0, %v1361_v1  ;;  %1139 = vmatpush3.msra.mxu0 %v1087_v10  ;;  %p1276_p0 = pnand %p1275_p8, %p1663_p11  ;;  %p1283_p6 = por %p1282_p3, %p1281_p13 }
  0x47   : > { %1166 = vmatprep.subr.bf16.mxu0 %v1359_v0 }
  0x48   : > { %p1277_p7 = pneg %p1276_p0 }
  0x4a   : > { %p1284_p4 = pnand %p1283_p6, %p1277_p7 }
 0x118   : > { %v483_v6 = vpop.f32.mrb[0].mxu0 }
 0x119   : > { %v1125_v7 = vpop.f32.mrb[1].mxu0  ;;  %v488_v8 = vsel %vm487_vm2, %v483_v6, -inf }
 0x11a   : > { %489 = vmax.xlane.f32.xlu0 %v488_v8 }
 0x1a7   : > { %v490_v11 = vpop.xlane.xlu0 %489 }
 0x1a8   : > { %v491_v12 = vsub.f32 %v483_v6, %v490_v11 }
 0x1aa   : > { %v492_v13 = vmul.f32 1.442695, %v491_v12 }
 0x1ac   : > { %1234 = vpow2.f32 %v492_v13 }
 0x1b6   : > { %v1235_v17 = vpop.eup %1234 }
 0x1b7   : > { %1129 = vmatmul.mubr.msk.f32.vlgmr.msra.gmra.mrb[0].mxu1 %vm487_vm2, %v1235_v17  ;;  %v494_v18 = vsel %vm487_vm2, %v1235_v17, 0.0 }
 0x1b8   : > { %1162 = vmatpush3.bf16.msra.mxu1 %v1161_v16  ;;  %495 = vadd.xlane.f32.xlu1 %v494_v18 }
 0x1b9   : > { %1135 = vmatprep.mubr.msk.f32.mxu1 %vm1360_vm0, %v1361_v1  ;;  %1163 = vmatprep.subr.bf16.mxu1 %v1359_v0 }
 0x1bb   : > { %1136 = vmatmul.mubr.msk.f32.vlgmr.msra.gmra.mrb[2].mxu1 %vm413_vm1, %v1083_v19 }
 0x1bc   : > { %1147 = vmatprep.mubr.msk.f32.mxu1 %vm1360_vm0, %v1361_v1  ;;  %1165 = vmatpush3.bf16.msra.mxu1 %v1164_v38 }
 0x245   : > { %v496_v28 = vpop.xlane.xlu1 %495 }
 0x28a   : > { %v567_v20 = vpop.f32.mrb[0].mxu1 }
 0x28b   : > { %v1130_v21 = vpop.f32.mrb[1].mxu1 }
 0x28e   : > { %v649_v22 = vpop.f32.mrb[2].mxu1 }
 0x28f   : > { %v1137_v23 = vpop.f32.mrb[3].mxu1  ;;  %v653_v24 = vsel %vm487_vm2, %v649_v22, -inf }
 0x290   : > { %654 = vmax.xlane.f32.xlu0 %v653_v24 }
 0x31d   : > { %v655_v25 = vpop.xlane.xlu0 %654 }
 0x31e   : > { %v656_v26 = vsub.f32 %v649_v22, %v655_v25 }
 0x320   : > { %v657_v27 = vmul.f32 1.442695, %v656_v26 }
 0x322   : > { %1236 = vpow2.f32 %v657_v27 }
 0x323   : > { %1238 = vrcp.f32 %v496_v28 }
 0x32c   : > { %v1237_v32 = vpop.eup %1236 }
 0x32d   : > { %1141 = vmatmul.mubr.msk.f32.vlgmr.msra.gmra.mrb[2].mxu0 %vm487_vm2, %v1237_v32  ;;  %v659_v33 = vsel %vm487_vm2, %v1237_v32, 0.0  ;;  %v1239_v34 = vpop.eup %1238 }
 0x32e   : > { %1168 = vmatpush3.bf16.msra.mxu0 %v1167_v31  ;;  %660 = vadd.xlane.f32.xlu1 %v659_v33  ;;  %v572_v35 = vmul.f32 %v1239_v34, %v567_v20 }
 0x32f   : > { %1154 = vmatprep.mubr.msk.f32.mxu0 %vm1360_vm0, %v1361_v1  ;;  %v1095_v1 = vld [vmem:[%s1653_s7] ss:$0 sm:$0xff] }
 0x331   : > { %1155 = vmatmul.mubr.msk.f32.vlgmr.msra.gmra.mrb[4].mxu0 %vm413_vm1, %v572_v35 }
 0x3bb   : > { %v661_v39 = vpop.xlane.xlu1 %660 }
 0x3bc   : > { %1240 = vrcp.f32 %v661_v39 }
 0x3c6   : > { %v1241_v40 = vpop.eup %1240 }
 0x400   : > { %v733_v41 = vpop.f32.mrb[2].mxu0 }
 0x401   : > { %v738_v42 = vmul.f32 %v1241_v40, %v733_v41  ;;  %v1142_v43 = vpop.f32.mrb[3].mxu0 }
 0x403   : > { %1148 = vmatmul.mubr.msk.f32.vlgmr.msra.gmra.mrb[4].mxu1 %vm413_vm1, %v738_v42 }
 0x404   : > { %v884_v44 = vpop.f32.mrb[4].mxu0 }
 0x405   : > { %v1156_v45 = vpop.f32.mrb[5].mxu0 }
 0x4d6   : > { %v811_v46 = vpop.f32.mrb[4].mxu1 }
 0x4d7   : > { %v885_v48 = vadd.f32 %v884_v44, %v811_v46  ;;  %v1149_v49 = vpop.f32.mrb[5].mxu1 }
 0x4d9   : > { %v895_v51 = vadd.f32 %v1093_v47, %v885_v48 }
 0x4db   : > { %v896_v52 = vadd.f32 %v895_v51, %v409_v50 }
 0x4dd   : > { %v898_v53 = vsel %vm897_vm3, %v896_v52, 0.0 }
 0x4de   : > { %899 = vadd.xlane.f32.xlu0 %v898_v53 }
 0x56b   : > { %v900_v54 = vpop.xlane.xlu0 %899 }
 0x56c   : > { %v902_v55 = vmul.f32 0.03125, %v900_v54 }
 0x56e   : > { %v903_v56 = vsub.f32 %v896_v52, %v902_v55 }
 0x570   : > { %v904_v57 = vmul.f32 %v903_v56, %v903_v56 }
 0x572   : > { %v905_v58 = vsel %vm897_vm3, %v904_v57, 0.0 }
 0x573   : > { %906 = vadd.xlane.f32.xlu1 %v905_v58 }
 0x600   : > { %v907_v59 = vpop.xlane.xlu1 %906 }
 0x601   : > { %v908_v60 = vmul.f32 0.03125, %v907_v59 }
 0x603   : > { %v909_v61 = vadd.f32 1e-05, %v908_v60 }
 0x605   : > { %1242 = vrsqrt.f32 %v909_v61 }
 0x60f   : > { %v1243_v62 = vpop.eup %1242 }
 0x610   : > { %v911_v0 = vmul.f32 %v1243_v62, %v903_v56 }
 0x612   : > { %v919_v2 = vmul.f32 %v1094_v63, %v911_v0 }
 0x614   : > { %v927_v3 = vadd.f32 %v1095_v1, %v919_v2 }
 0x616   : > { %928 = vst.msk [vmem:[%s390_s11] sm:$0xff] %vm897_vm3, %v927_v3 }
 0x617   : > { %1287 = shalt.err (!%p1284_p4)
}
 0x618   : > { %s1288_s23 = scalar_lea.hbm %s1596_s16, 128  ;;  %s1292_s11 = scalar_lea.hbm %s1654_s8, 256 }
 0x619   : > { %p1289_p10 = scmp.ne.s32.totalorder %s1596_s16, %s1288_s23  ;;  %p1293_p2 = scmp.lt.u32.totalorder %s1596_s16, %s1654_s8 }
 0x61a   : > { %p1294_p5 = scmp.lt.u32.totalorder %s1292_s11, %s1288_s23  ;;  %p1296_p8 = scmp.lt.u32.totalorder %s1288_s23, %s1596_s16 }
 0x61b   : > { %p1290_p12 = pnand %p1289_p10, %p1663_p11 }
 0x61c   : > { %p1295_p9 = por %p1294_p5, %p1293_p2 }
 0x61d   : > { %p1291_p1 = pneg %p1290_p12 }
 0x61e   : > { %p1297_p0 = por %p1296_p8, %p1295_p9 }
 0x620   : > { %p1298_p7 = pnand %p1297_p0, %p1291_p1 }
 0x622   : > { %1301 = shalt.err (!%p1298_p7)
}
 0x623   : > { %1171 = dma.vmem_to_hbm [thread:$0]  (%p1663_p11), %s1598_s26, 128, %s1596_s16, %s930_s14  }
 0x624 PF: > { %s956_s21 = sand.u32 1, %s1336_s27   ;;  %p1664_p13 = scmp.ne.s32.totalorder %s1659_s20, 0 }
 0x625   : > { %p1665_p3 = scmp.ge.s32.totalorder %s1356_s10, 2  ;;  %s957_s30 = scalar_lea.sflag [#allocation4], %s956_s21 }
 0x627   : > { %p1178_p6 = pnand %p1665_p3, %p1664_p13 }
 0x629   : > { %1331 = dma.done.wait (!%p1178_p6), %s957_s30, 128  }
 0x62a   : > { %1333 = vsyncadd (!%p1178_p6), %s957_s30, 4294967168  ;;  %s24_s10 = sadd.s32 1, %s1356_s10   ;;  %s1666_s27 = smov %s1340_s28 }
 0x62b   : > { %p21_p4 = scmp.ge.s32.totalorder %s24_s10, 4   ;;  %s1667_s28 = smov %s1344_s29 }
 0x62c   : > { %s1668_s29 = smov %s1464_s19  ;;  %s1669_s30 = smov %s1352_s9 }
 0x62d   : > { %s1670_s9 = smov %s1672_s13  ;;  %23 = sbr.rel (!%p21_p4) target bundleno = 6 (0x6), region = 110 }
 0x634   :  { %962 = vsyncpa [#allocation3], 1 }
 0x635   :  { %964 = vsyncpa [#allocation3 + $0x1], 1 }
 0x636   :  { %965 = vsyncpa [#allocation4], 1 }
 0x637   :  { %967 = vsyncpa [#allocation4 + $0x1], 1 }

</bundles_post_ra>
